<compile_context>
chip_gen: v6e
topology: v6e:2x2x1
jax: 0.10.0
libtpu: 0.0.40
codegen_flags: <defaults>
</compile_context>

<pallas_src>
import functools

import jax
import jax.numpy as jnp
from jax.experimental import pallas as pl
from jax.experimental.pallas import tpu as pltpu


HIDDEN = 64
A_PAD = 8  # pad the tiny action dim to a full 8-sublane tile for unmasked stores


# ------------------------------------------------------------------ parameters

def init_params(key, state_dim, action_dim, hidden=HIDDEN):
    """PyTorch-style Linear init (uniform +-1/sqrt(fan_in)), torch (out, in) layout."""
    keys = jax.random.split(key, 6)

    def lin(kw, kb, fan_in, fan_out):
        bound = 1.0 / jnp.sqrt(jnp.float32(fan_in))
        w = jax.random.uniform(kw, (fan_out, fan_in), jnp.float32, -bound, bound)
        b = jax.random.uniform(kb, (fan_out,), jnp.float32, -bound, bound)
        return w, b

    w1, b1 = lin(keys[0], keys[1], state_dim, hidden)
    w2, b2 = lin(keys[2], keys[3], hidden, hidden)
    w3, b3 = lin(keys[4], keys[5], hidden, action_dim)
    return {"w1": w1, "b1": b1, "w2": w2, "b2": b2, "w3": w3, "b3": b3}


def pack_params(p, state_dim, action_dim, hidden=HIDDEN):
    """Pack weights into a zero-padded bf16 slab (3, H, H) and biases into f32 (H, 8).

    weight slab: page 0 [:, :S] = w1 (H,S); page 1 = w2 (H,H); page 2 [:A, :] = w3 (A,H)
    bias slab  : col 0 = b1, col 1 = b2, col 2 rows [:A] = b3 (rest zero)
    """
    H, S, A = hidden, state_dim, action_dim
    assert S <= H and A <= A_PAD <= H
    wslab = jnp.zeros((3, H, H), jnp.bfloat16)
    wslab = wslab.at[0, :, :S].set(p["w1"].astype(jnp.bfloat16))
    wslab = wslab.at[1].set(p["w2"].astype(jnp.bfloat16))
    wslab = wslab.at[2, :A, :].set(p["w3"].astype(jnp.bfloat16))
    bias = jnp.zeros((H, 8), jnp.float32)
    bias = bias.at[:, 0].set(p["b1"])
    bias = bias.at[:, 1].set(p["b2"])
    bias = bias.at[:A, 2].set(p["b3"])
    return wslab, bias


# ------------------------------------------------------------------ tiling policy

def _round_up(x, m):
    return ((x + m - 1) // m) * m


def _default_tiles(batch, max_tb):
    """Minimum grid steps: 1 on v5e/v6e; 2 balanced steps on v7x for large batches."""
    b128 = _round_up(max(batch, 1), 128)
    tiles = -(-b128 // max_tb)  # minimum tiles so tb <= max_tb
    if tiles == 1 and b128 > 128:
        try:
            kind = jax.devices()[0].device_kind.lower()
        except Exception:
            kind = ""
        if "v7" in kind:
            tiles = 2  # split the batch across v7x's two TensorCores
    return tiles


# ------------------------------------------------------------------ pallas kernel

def _qnet_kernel(x_ref, w_ref, b_ref, o_ref, *, state_dim):
    S = state_dim
    xb = x_ref[...].astype(jnp.bfloat16)                 # (tb, S) bf16 (cast in-kernel)

    # Static carve-outs of the resident, pre-cast bf16 weight slab (no per-step casts).
    w1 = w_ref[0][:, :S]                                 # (H, S) bf16
    w2 = w_ref[1]                                        # (H, H) bf16
    w3 = w_ref[2][:A_PAD, :]                             # (A_PAD, H) bf16
    b1 = b_ref[:, 0:1]                                   # (H, 1) f32
    b2 = b_ref[:, 1:2]                                   # (H, 1) f32
    b3 = b_ref[:A_PAD, 2:3]                              # (A_PAD, 1) f32

    # Feature-major compute: batch rides on the lane axis, f32 MXU accumulation.
    # Layer 1 contracts w1's S axis against x's S axis (q@k.T-style dot_general),
    # so no host-side or in-kernel explicit transpose of x is needed.
    h1 = jax.lax.dot_general(w1, xb, (((1,), (1,)), ((), ())),
                             preferred_element_type=jnp.float32) + b1        # (H, tb)
    h1 = jnp.maximum(h1, 0.0)
    h2 = jnp.dot(w2, h1.astype(jnp.bfloat16),
                 preferred_element_type=jnp.float32) + b2                    # (H, tb)
    h2 = jnp.maximum(h2, 0.0)
    out = jnp.dot(w3, h2.astype(jnp.bfloat16),
                  preferred_element_type=jnp.float32) + b3                   # (A_PAD, tb)
    o_ref[...] = out                                     # full-vreg, lane-dense store


def qnetwork_forward(x, wslab, bias, *, state_dim, action_dim,
                     max_tb=1024, target_tiles=None):
    """x: (B, state_dim) f32.  wslab: (3,H,H) bf16.  bias: (H,8) f32.  Returns (B, A) f32."""
    B, S = x.shape
    assert S == state_dim
    H = wslab.shape[1]
    A = action_dim
    assert wslab.shape == (3, H, H) and bias.shape == (H, 8)

    tiles = _default_tiles(B, max_tb) if target_tiles is None else max(1, target_tiles)
    tb = _round_up(-(-B // tiles), 128)                  # batch tile rides on lanes
    b_pad = tb * tiles

    xp = x if b_pad == B else jnp.pad(x, ((0, b_pad - B), (0, 0)))

    out_t = pl.pallas_call(
        functools.partial(_qnet_kernel, state_dim=S),
        out_shape=jax.ShapeDtypeStruct((A_PAD, b_pad), jnp.float32),
        grid_spec=pltpu.PrefetchScalarGridSpec(
            num_scalar_prefetch=0,
            grid=(tiles,),
            in_specs=[
                pl.BlockSpec((tb, S), lambda i: (i, 0)),        # activation tile
                pl.BlockSpec((3, H, H), lambda i: (0, 0, 0)),   # weights VMEM-resident
                pl.BlockSpec((H, 8), lambda i: (0, 0)),         # biases VMEM-resident
            ],
            out_specs=pl.BlockSpec((A_PAD, tb), lambda i: (0, i)),
        ),
        compiler_params=pltpu.CompilerParams(
            dimension_semantics=("parallel",)),          # batch tiles split across TCs
    )(xp, wslab, bias)

    return out_t[:A].T[:B]                               # back to (B, A)


# ------------------------------------------------------------------ references

def qnetwork_ref(x, p):
    h1 = jnp.maximum(x @ p["w1"].T + p["b1"], 0.0)
    h2 = jnp.maximum(h1 @ p["w2"].T + p["b2"], 0.0)
    return h2 @ p["w3"].T + p["b3"]


def qnetwork_ref_bf16(x, p):
    c = lambda a: a.astype(jnp.bfloat16).astype(jnp.float32)
    h1 = jnp.maximum(c(x) @ c(p["w1"]).T + p["b1"], 0.0)
    h2 = jnp.maximum(c(h1) @ c(p["w2"]).T + p["b2"], 0.0)
    return c(h2) @ c(p["w3"]).T + p["b3"]


# ------------------------------------------------------------------ main

if __name__ == "__main__":
    # FrozenLake: 16 states (one-hot-ish), 4 actions.
    B, STATE_DIM, ACTION_DIM = 8, 16, 4

    key = jax.random.PRNGKey(0)
    k_params, k_x, k_xb = jax.random.split(key, 3)
    params = init_params(k_params, STATE_DIM, ACTION_DIM)
    wslab, bias = pack_params(params, STATE_DIM, ACTION_DIM)

    fwd = jax.jit(functools.partial(
        qnetwork_forward, state_dim=STATE_DIM, action_dim=ACTION_DIM))

    # Small online-step batch (single grid tile).
    x = jax.random.uniform(k_x, (B, STATE_DIM), jnp.float32)
    out = jax.block_until_ready(fwd(x, wslab, bias))
    assert out.shape == (B, ACTION_DIM)
    assert jnp.allclose(out, qnetwork_ref_bf16(x, params), atol=2e-2, rtol=2e-2), \
        "mismatch vs bf16-matched reference"
    assert jnp.allclose(out, qnetwork_ref(x, params), atol=5e-2, rtol=5e-2), \
        "mismatch vs f32 reference"

    # Replay-buffer-sized batch (1 grid step on v5e/v6e, 2 balanced steps on v7x).
    xb = jax.random.uniform(k_xb, (600, STATE_DIM), jnp.float32)
    outb = jax.block_until_ready(fwd(xb, wslab, bias))
    assert outb.shape == (600, ACTION_DIM)
    assert jnp.allclose(outb, qnetwork_ref_bf16(xb, params), atol=2e-2, rtol=2e-2), \
        "mismatch vs bf16-matched reference (batched)"

    print("KERNEL_OK")
</pallas_src>

<mosaic_0001>
module attributes {stable_mosaic.version = 11 : i64} {
  func.func @_qnet_kernel(%arg0: i32, %arg1: memref<128x16xf32, #tpu.memory_space<vmem>>, %arg2: memref<3x64x64xbf16, #tpu.memory_space<vmem>>, %arg3: memref<64x8xf32, #tpu.memory_space<vmem>>, %arg4: memref<8x128xf32, #tpu.memory_space<vmem>>) attributes {dimension_semantics = [#tpu.dimension_semantics<parallel>], iteration_bounds = array<i64: 1>, scalar_prefetch = 0 : i64, scratch_operands = 0 : i64, tpu.core_type = #tpu.core_type<tc>, window_params = [{transform_indices = @transform_0, window_bounds = array<i64: 128, 16>}, {pipeline_mode = #tpu.pipeline_mode<synchronous>, transform_indices = @transform_1, window_bounds = array<i64: 3, 64, 64>}, {pipeline_mode = #tpu.pipeline_mode<synchronous>, transform_indices = @transform_2, window_bounds = array<i64: 64, 8>}, {transform_indices = @transform_3, window_bounds = array<i64: 8, 128>}]} {
    %c0 = arith.constant 0 : index
    %c0_0 = arith.constant 0 : index
    %0 = vector.load %arg1[%c0, %c0_0] : memref<128x16xf32, #tpu.memory_space<vmem>>, vector<128x16xf32>
    %1 = arith.truncf %0 : vector<128x16xf32> to vector<128x16xbf16>
    %c0_1 = arith.constant 0 : index
    %c0_2 = arith.constant 0 : index
    %c0_3 = arith.constant 0 : index
    %2 = vector.load %arg2[%c0_1, %c0_2, %c0_3] : memref<3x64x64xbf16, #tpu.memory_space<vmem>>, vector<1x64x64xbf16>
    %3 = vector.shape_cast %2 : vector<1x64x64xbf16> to vector<64x64xbf16>
    %4 = vector.extract_strided_slice %3 {offsets = [0, 0], sizes = [64, 16], strides = [1, 1]} : vector<64x64xbf16> to vector<64x16xbf16>
    %c1 = arith.constant 1 : index
    %c0_4 = arith.constant 0 : index
    %c0_5 = arith.constant 0 : index
    %5 = vector.load %arg2[%c1, %c0_4, %c0_5] : memref<3x64x64xbf16, #tpu.memory_space<vmem>>, vector<1x64x64xbf16>
    %6 = vector.shape_cast %5 : vector<1x64x64xbf16> to vector<64x64xbf16>
    %c2 = arith.constant 2 : index
    %c0_6 = arith.constant 0 : index
    %c0_7 = arith.constant 0 : index
    %7 = vector.load %arg2[%c2, %c0_6, %c0_7] : memref<3x64x64xbf16, #tpu.memory_space<vmem>>, vector<1x64x64xbf16>
    %8 = vector.shape_cast %7 : vector<1x64x64xbf16> to vector<64x64xbf16>
    %9 = vector.extract_strided_slice %8 {offsets = [0, 0], sizes = [8, 64], strides = [1, 1]} : vector<64x64xbf16> to vector<8x64xbf16>
    %c0_8 = arith.constant 0 : index
    %c0_9 = arith.constant 0 : index
    %10 = vector.load %arg3[%c0_8, %c0_9] : memref<64x8xf32, #tpu.memory_space<vmem>>, vector<64x1xf32>
    %c0_10 = arith.constant 0 : index
    %c1_11 = arith.constant 1 : index
    %11 = vector.load %arg3[%c0_10, %c1_11] : memref<64x8xf32, #tpu.memory_space<vmem>>, vector<64x1xf32>
    %c0_12 = arith.constant 0 : index
    %c2_13 = arith.constant 2 : index
    %12 = vector.load %arg3[%c0_12, %c2_13] : memref<64x8xf32, #tpu.memory_space<vmem>>, vector<8x1xf32>
    %cst = arith.constant dense<0.000000e+00> : vector<64x128xf32>
    %13 = tpu.matmul %4, %1, %cst {dimension_numbers = #tpu.dot_dimension_numbers<[1], [1], [0], [0], [0, 0, 1, 0], [], []>} : vector<64x16xbf16>, vector<128x16xbf16>, vector<64x128xf32> -> vector<64x128xf32>
    %14 = vector.broadcast %10 : vector<64x1xf32> to vector<64x128xf32>
    %15 = arith.addf %13, %14 : vector<64x128xf32>
    %cst_14 = arith.constant 0.000000e+00 : f32
    %16 = vector.broadcast %cst_14 : f32 to vector<64x128xf32>
    %17 = arith.maximumf %15, %16 : vector<64x128xf32>
    %18 = arith.truncf %17 : vector<64x128xf32> to vector<64x128xbf16>
    %cst_15 = arith.constant dense<0.000000e+00> : vector<64x128xf32>
    %19 = tpu.matmul %6, %18, %cst_15 {dimension_numbers = #tpu.dot_dimension_numbers<[1], [0], [0], [1], [0, 0, 1, 1], [], []>} : vector<64x64xbf16>, vector<64x128xbf16>, vector<64x128xf32> -> vector<64x128xf32>
    %20 = vector.broadcast %11 : vector<64x1xf32> to vector<64x128xf32>
    %21 = arith.addf %19, %20 : vector<64x128xf32>
    %cst_16 = arith.constant 0.000000e+00 : f32
    %22 = vector.broadcast %cst_16 : f32 to vector<64x128xf32>
    %23 = arith.maximumf %21, %22 : vector<64x128xf32>
    %24 = arith.truncf %23 : vector<64x128xf32> to vector<64x128xbf16>
    %cst_17 = arith.constant dense<0.000000e+00> : vector<8x128xf32>
    %25 = tpu.matmul %9, %24, %cst_17 {dimension_numbers = #tpu.dot_dimension_numbers<[1], [0], [0], [1], [0, 0, 1, 1], [], []>} : vector<8x64xbf16>, vector<64x128xbf16>, vector<8x128xf32> -> vector<8x128xf32>
    %26 = vector.broadcast %12 : vector<8x1xf32> to vector<8x128xf32>
    %27 = arith.addf %25, %26 : vector<8x128xf32>
    %c0_18 = arith.constant 0 : index
    %c0_19 = arith.constant 0 : index
    %28 = vector.load %arg4[%c0_18, %c0_19] : memref<8x128xf32, #tpu.memory_space<vmem>>, vector<8x128xf32>
    tpu.vector_store %arg4[%c0_18, %c0_19], %27 {strides = array<i32>} : memref<8x128xf32, #tpu.memory_space<vmem>>, vector<8x128xf32>,
    return
  }
  func.func @transform_0(%arg0: i32) -> (i32, i32) {
    %c0_i32 = arith.constant 0 : i32
    %c0_i32_0 = arith.constant 0 : i32
    return %arg0, %c0_i32 : i32, i32
  }
  func.func @transform_1(%arg0: i32) -> (i32, i32, i32) {
    %c0_i32 = arith.constant 0 : i32
    %c0_i32_0 = arith.constant 0 : i32
    %c0_i32_1 = arith.constant 0 : i32
    %c0_i32_2 = arith.constant 0 : i32
    return %c0_i32, %c0_i32_0, %c0_i32_1 : i32, i32, i32
  }
  func.func @transform_2(%arg0: i32) -> (i32, i32) {
    %c0_i32 = arith.constant 0 : i32
    %c0_i32_0 = arith.constant 0 : i32
    %c0_i32_1 = arith.constant 0 : i32
    return %c0_i32, %c0_i32_0 : i32, i32
  }
  func.func @transform_3(%arg0: i32) -> (i32, i32) {
    %c0_i32 = arith.constant 0 : i32
    %c0_i32_0 = arith.constant 0 : i32
    return %c0_i32, %arg0 : i32, i32
  }
}

</mosaic_0001>

<bundles_post_ra>
// kernel: qnetwork_forward.1
= control target key start
LH: loop header
LB: loop body
LE: loop exit
PB: predicated region body
PF: predicated region fallthrough
CT: control target
= control target key end

     0   :  { %vm126_vm0 = vcmask 130048   ;;  %v564_v3 = vmov 0   ;;  %vm292_vm1 = vcmask 523264   ;;  %v565_v46 = vmov 1   ;;  %s721_s0 = inlined_call_operand.vmem [shape: f32[128,16], index: 0, kind: input, shape index: {}]   ;;  %s722_s1 = inlined_call_operand.vmem [shape: bf16[3,64,64], index: 1, kind: input, shape index: {}]   ;;  %s723_s2 = inlined_call_operand.vmem [shape: f32[64,8], index: 2, kind: input, shape index: {}]   ;;  %s724_s3 = inlined_call_operand.vmem [shape: f32[8,128], index: 3, kind: output, shape index: {}]  }
   0x1   :  { %v29_v0 = vld [vmem:[%s721_s0 + $0x70] sm:$0xff]  ;;  %v30_v1 = vld [vmem:[%s721_s0 + $0x78] sm:$0xff]  ;;  %v27_v2 = vld [vmem:[%s721_s0 + $0x60] sm:$0xff]  ;;  %550 = vset.pattern.permute.xlu0 %v564_v3  ;;  %551 = vset.pattern.permute.xlu1 %v564_v3  ;;  %vm567_vm2 = vmmov 0  }
   0x2   :  { %v38_v4 = vpack.c.bf16 %v30_v1, %v29_v0  ;;  %v28_v5 = vld [vmem:[%s721_s0 + $0x68] sm:$0xff]  ;;  %v25_v8 = vld [vmem:[%s721_s0 + $0x50] sm:$0xff]  ;;  %v26_v9 = vld [vmem:[%s721_s0 + $0x58] sm:$0xff] }
   0x3   :  { %v37_v6 = vpack.c.bf16 %v28_v5, %v27_v2  ;;  %v556_v10 = vld [vmem:[%s722_s1] sm:$0xff]   ;;  %v36_v12 = vpack.c.bf16 %v26_v9, %v25_v8  ;;  %v64_v13 = vld [vmem:[%s723_s2 + $0x30] sm:$0xff]  ;;  %v65_v15 = vld [vmem:[%s723_s2 + $0x38] sm:$0xff] }
   0x4   :  { %537 = vmatprep.subr.msk.bf16.mxu0 %vm126_vm0, %v38_v4  ;;  %v161_v7 = vsel %vm126_vm0, %v38_v4, 0  ;;  %501 = vmatprep.mubr.msk.bf16.mxu0 %vm126_vm0, %v556_v10  ;;  %v62_v14 = vld [vmem:[%s723_s2 + $0x20] sm:$0xff]  ;;  %v63_v16 = vld [vmem:[%s723_s2 + $0x28] sm:$0xff]  ;;  %v60_v19 = vld [vmem:[%s723_s2 + $0x10] sm:$0xff] }
   0x5   :  { %486 = vmatpush3.bf16.xpose.msra.mxu0 %v161_v7  ;;  %v158_v11 = vsel %vm126_vm0, %v37_v6, 0  ;;  %98 = vperm.xlu0 %550, %v64_v13   ;;  %v23_v17 = vld [vmem:[%s721_s0 + $0x40] sm:$0xff]  ;;  %v24_v18 = vld [vmem:[%s721_s0 + $0x48] sm:$0xff]  ;;  %v61_v20 = vld [vmem:[%s723_s2 + $0x18] sm:$0xff]  ;;  %v155_v21 = vsel %vm126_vm0, %v36_v12, 0 }
   0x6   :  { %538 = vmatprep.subr.msk.bf16.mxu0 %vm126_vm0, %v37_v6  ;;  %88 = vperm.xlu1 %551, %v62_v14   ;;  %v35_v22 = vpack.c.bf16 %v24_v18, %v23_v17  ;;  %v644_v23 = vld [vmem:[%s723_s2] sm:$0xff]  ;;  %v59_v24 = vld [vmem:[%s723_s2 + $0x8] sm:$0xff]  ;;  %v21_v25 = vld [vmem:[%s721_s0 + $0x30] sm:$0xff] }
   0x7   :  { %v22_v26 = vld [vmem:[%s721_s0 + $0x38] sm:$0xff]  ;;  %v19_v29 = vld [vmem:[%s721_s0 + $0x20] sm:$0xff]  ;;  %v20_v30 = vld [vmem:[%s721_s0 + $0x28] sm:$0xff] }
   0x8   :  { %v152_v27 = vsel %vm126_vm0, %v35_v22, 0  ;;  %v34_v28 = vpack.c.bf16 %v22_v26, %v21_v25  ;;  %v33_v32 = vpack.c.bf16 %v20_v30, %v19_v29  ;;  %v17_v33 = vld [vmem:[%s721_s0 + $0x10] sm:$0xff]  ;;  %v18_v34 = vld [vmem:[%s721_s0 + $0x18] sm:$0xff]  ;;  %v15_v37 = vld [vmem:[%s721_s0] sm:$0xff] }
   0x9   :  { %103 = vperm.xlu0 %550, %v65_v15   ;;  %v32_v36 = vpack.c.bf16 %v18_v34, %v17_v33  ;;  %v16_v38 = vld [vmem:[%s721_s0 + $0x8] sm:$0xff]  ;;  %v558_v43 = vld [vmem:[%s722_s1 + $0x10] sm:$0xff]   ;;  %v559_v44 = vld [vmem:[%s722_s1 + $0x18] sm:$0xff]  }
   0xa   :  { %93 = vperm.xlu1 %551, %v63_v16   ;;  %v149_v31 = vsel %vm126_vm0, %v34_v28, 0  ;;  %v146_v35 = vsel %vm126_vm0, %v33_v32, 0  ;;  %v31_v40 = vpack.c.bf16 %v16_v38, %v15_v37  ;;  %v557_v42 = vld [vmem:[%s722_s1 + $0x8] sm:$0xff]   ;;  %v560_v45 = vld [vmem:[%s722_s1 + $0x20] sm:$0xff]  }
   0xb   :  { %v143_v39 = vsel %vm126_vm0, %v32_v36, 0  ;;  %517 = vmatprep.mubr.msk.bf16.mxu1 %vm292_vm1, %v560_v45 }
   0xc   :  { %v140_v41 = vsel %vm126_vm0, %v31_v40, 0 }
   0xd   :  { %488 = vmatpush3.bf16.xpose.msra.mxu0 %v158_v11  ;;  %78 = vperm.xlu0 %550, %v60_v19  }
   0xe   :  { %539 = vmatprep.subr.msk.bf16.mxu0 %vm126_vm0, %v36_v12  ;;  %83 = vperm.xlu1 %551, %v61_v20  }
  0x11   :  { %68 = vperm.xlu0 %550, %v644_v23  }
  0x12   :  { %73 = vperm.xlu1 %551, %v59_v24  }
  0x15   :  { %490 = vmatpush3.bf16.xpose.msra.mxu0 %v155_v21  ;;  %552 = vset.pattern.permute.xlu0 %v565_v46  ;;  %v563_v21 = vld [vmem:[%s722_s1 + $0x38] sm:$0xff]  }
  0x16   :  { %540 = vmatprep.subr.msk.bf16.mxu0 %vm126_vm0, %v35_v22  ;;  %553 = vset.pattern.permute.xlu1 %v565_v46  ;;  %v566_v22 = vmov 0.0  }
  0x17   :  { %269 = vperm.xlu1 %553, %v65_v15   ;;  %265 = vperm.xlu0 %552, %v64_v13  }
  0x1b   :  { %257 = vperm.xlu1 %553, %v62_v14   ;;  %261 = vperm.xlu0 %552, %v63_v16  }
  0x1d   :  { %492 = vmatpush3.bf16.xpose.msra.mxu0 %v152_v27 }
  0x1e   :  { %541 = vmatprep.subr.msk.bf16.mxu0 %vm126_vm0, %v34_v28 }
  0x1f   :  { %249 = vperm.xlu1 %553, %v60_v19   ;;  %253 = vperm.xlu0 %552, %v61_v20   ;;  %v561_v19 = vld [vmem:[%s722_s1 + $0x28] sm:$0xff]   ;;  %v562_v20 = vld [vmem:[%s722_s1 + $0x30] sm:$0xff]  }
  0x23   :  { %241 = vperm.xlu1 %553, %v644_v23   ;;  %245 = vperm.xlu0 %552, %v59_v24   ;;  %v568_v24 = vmov 2  }
  0x25   :  { %494 = vmatpush3.bf16.xpose.msra.mxu0 %v149_v31 }
  0x26   :  { %542 = vmatprep.subr.msk.bf16.mxu0 %vm126_vm0, %v33_v32 }
  0x27   :  { %554 = vset.pattern.permute.xlu1 %v568_v24  ;;  %555 = vset.pattern.permute.xlu0 %v568_v24 }
  0x28   :  { %383 = vperm.xlu1 %554, %v644_v23  }
  0x2d   :  { %496 = vmatpush3.bf16.xpose.msra.mxu0 %v146_v35 }
  0x2e   :  { %543 = vmatprep.subr.msk.bf16.mxu0 %vm126_vm0, %v32_v36 }
  0x35   :  { %498 = vmatpush3.bf16.xpose.msra.mxu0 %v143_v39 }
  0x36   :  { %544 = vmatprep.subr.msk.bf16.mxu0 %vm126_vm0, %v31_v40 }
  0x3d   :  { %500 = vmatpush3.bf16.xpose.msra.mxu0 %v140_v41 }
  0x44   :  { %502 = vmatmul.mubr.msk.bf16.vlgmr.msra.gmra.mxu0 %vm126_vm0, %v557_v42 }
  0x45   :  { %505 = vmatprep.mubr.msk.bf16.mxu0 %vm126_vm0, %v558_v43 }
  0x4c   :  { %506 = vmatmul.mubr.msk.bf16.gmra.mxu0 %vm126_vm0, %v559_v44 }
  0x80   :  { %v99_v48 = vpop.permute.xlu0 %98 }
  0x81   :  { %v89_v47 = vpop.permute.xlu1 %88 }
  0x84   :  { %v104_v53 = vpop.permute.xlu0 %103 }
  0x85   :  { %v94_v51 = vpop.permute.xlu1 %93 }
  0x88   :  { %v79_v59 = vpop.permute.xlu0 %78 }
  0x89   :  { %v84_v56 = vpop.permute.xlu1 %83 }
  0x8c   :  { %v69_v9 = vpop.permute.xlu0 %68 }
  0x8d   :  { %v74_v4 = vpop.permute.xlu1 %73 }
  0x92   :  { %v266_v25 = vpop.permute.xlu0 %265  ;;  %v270_v27 = vpop.permute.xlu1 %269 }
  0x96   :  { %v262_v30 = vpop.permute.xlu0 %261  ;;  %v258_v32 = vpop.permute.xlu1 %257 }
  0x9a   :  { %v254_v36 = vpop.permute.xlu0 %253  ;;  %v250_v39 = vpop.permute.xlu1 %249 }
 0x104   :  { %v503_v49 = vpop.f32.mrf.mxu0 }
 0x105   :  { %v206_v5 = vadd.f32 %v503_v49, %v79_v59 }
 0x106   :  { %v197_v50 = vpop.f32.mrf.mxu0 }
 0x107   :  { %v230_v13 = vmax.f32 %v206_v5, 0.0  ;;  %v198_v14 = vadd.f32 %v197_v50, %v69_v9  ;;  %v242_v50 = vpop.permute.xlu1 %241 }
 0x108   :  { %v504_v52 = vpop.f32.mrf.mxu0 }
 0x109   :  { %v209_v0 = vadd.f32 %v504_v52, %v84_v56  ;;  %v228_v17 = vmax.f32 %v198_v14, 0.0 }
 0x10a   :  { %v200_v54 = vpop.f32.mrf.mxu0 }
 0x10b   :  { %v231_v10 = vmax.f32 %v209_v0, 0.0  ;;  %v201_v11 = vadd.f32 %v200_v54, %v74_v4 }
 0x10c   :  { %v507_v55 = vpop.f32.mrf.mxu0 }
 0x10d   :  { %v222_v58 = vadd.f32 %v507_v55, %v99_v48  ;;  %v237_v15 = vpack.c.bf16 %v231_v10, %v230_v13  ;;  %v229_v16 = vmax.f32 %v201_v11, 0.0 }
 0x10e   :  { %v213_v57 = vpop.f32.mrf.mxu0 }
 0x10f   :  { %v214_v61 = vadd.f32 %v213_v57, %v89_v47  ;;  %v234_v1 = vmax.f32 %v222_v58, 0.0  ;;  %v236_v18 = vpack.c.bf16 %v229_v16, %v228_v17  ;;  %v246_v47 = vpop.permute.xlu0 %245 }
 0x110   :  { %v508_v60 = vpop.f32.mrf.mxu0 }
 0x111   :  { %v225_v62 = vadd.f32 %v508_v60, %v104_v53  ;;  %v232_v6 = vmax.f32 %v214_v61, 0.0  ;;  %v442_v60 = vld [vmem:[%s722_s1 + $0x40] sm:$0xf]  ;;  %v384_v61 = vpop.permute.xlu1 %383 }
 0x112   :  { %v216_v63 = vpop.f32.mrf.mxu0 }
 0x113   :  { %v235_v2 = vmax.f32 %v225_v62, 0.0  ;;  %v217_v3 = vadd.f32 %v216_v63, %v94_v51 }
 0x115   :  { %v233_v7 = vmax.f32 %v217_v3, 0.0  ;;  %v239_v8 = vpack.c.bf16 %v235_v2, %v234_v1 }
 0x117   :  { %v238_v12 = vpack.c.bf16 %v233_v7, %v232_v6  ;;  %509 = vmatprep.subr.bf16.mxu1 %v239_v8 }
 0x118   :  { %510 = vmatpush3.bf16.msra.mxu1 %v239_v8 }
 0x119   :  { %511 = vmatprep.subr.bf16.mxu1 %v238_v12 }
 0x11c   :  { %512 = vmatpush3.bf16.msra.mxu1 %v238_v12 }
 0x11d   :  { %513 = vmatprep.subr.bf16.mxu1 %v237_v15 }
 0x120   :  { %514 = vmatpush3.bf16.msra.mxu1 %v237_v15 }
 0x121   :  { %515 = vmatprep.subr.bf16.mxu1 %v236_v18 }
 0x124   :  { %516 = vmatpush3.bf16.msra.mxu1 %v236_v18 }
 0x125   :  { %525 = vmatprep.subr.bf16.mxu1 %v566_v22 }
 0x127   :  { %518 = vmatmul.mubr.msk.bf16.vlgmr.msra.gmra.mxu1 %vm292_vm1, %v561_v19 }
 0x128   :  { %521 = vmatprep.mubr.msk.bf16.mxu1 %vm292_vm1, %v562_v20 }
 0x12f   :  { %522 = vmatmul.mubr.msk.bf16.gmra.mxu1 %vm292_vm1, %v563_v21 }
 0x130   :  { %533 = vmatprep.mubr.msk.bf16.mxu1 %vm567_vm2, %v566_v22 }
 0x1e7   :  { %v519_v26 = vpop.f32.mrf.mxu1 }
 0x1e8   :  { %v348_v48 = vadd.f32 %v519_v26, %v250_v39 }
 0x1e9   :  { %v339_v28 = vpop.f32.mrf.mxu1 }
 0x1ea   :  { %v372_v54 = vmax.f32 %v348_v48, 0.0  ;;  %v340_v55 = vadd.f32 %v339_v28, %v242_v50 }
 0x1eb   :  { %v520_v29 = vpop.f32.mrf.mxu1 }
 0x1ec   :  { %v351_v44 = vadd.f32 %v520_v29, %v254_v36  ;;  %v370_v58 = vmax.f32 %v340_v55, 0.0 }
 0x1ed   :  { %v342_v31 = vpop.f32.mrf.mxu1 }
 0x1ee   :  { %v373_v51 = vmax.f32 %v351_v44, 0.0  ;;  %v343_v52 = vadd.f32 %v342_v31, %v246_v47 }
 0x1ef   :  { %v523_v33 = vpop.f32.mrf.mxu1 }
 0x1f0   :  { %v364_v35 = vadd.f32 %v523_v33, %v266_v25  ;;  %v379_v56 = vpack.c.bf16 %v373_v51, %v372_v54  ;;  %v371_v57 = vmax.f32 %v343_v52, 0.0 }
 0x1f1   :  { %v355_v34 = vpop.f32.mrf.mxu1 }
 0x1f2   :  { %v376_v41 = vmax.f32 %v364_v35, 0.0  ;;  %v356_v42 = vadd.f32 %v355_v34, %v258_v32  ;;  %v378_v59 = vpack.c.bf16 %v371_v57, %v370_v58 }
 0x1f3   :  { %v524_v37 = vpop.f32.mrf.mxu1 }
 0x1f4   :  { %v367_v38 = vadd.f32 %v524_v37, %v270_v27  ;;  %v374_v49 = vmax.f32 %v356_v42, 0.0 }
 0x1f5   :  { %v358_v40 = vpop.f32.mrf.mxu1 }
 0x1f6   :  { %v377_v43 = vmax.f32 %v367_v38, 0.0  ;;  %v359_v23 = vadd.f32 %v358_v40, %v262_v30 }
 0x1f8   :  { %v381_v45 = vpack.c.bf16 %v377_v43, %v376_v41  ;;  %v375_v46 = vmax.f32 %v359_v23, 0.0 }
 0x1fa   :  { %526 = vmatpush3.bf16.msra.mxu1 %v381_v45  ;;  %v380_v53 = vpack.c.bf16 %v375_v46, %v374_v49 }
 0x1fb   :  { %527 = vmatprep.subr.bf16.mxu1 %v566_v22 }
 0x1fe   :  { %528 = vmatpush3.bf16.msra.mxu1 %v380_v53 }
 0x1ff   :  { %529 = vmatprep.subr.bf16.mxu1 %v566_v22 }
 0x202   :  { %530 = vmatpush3.bf16.msra.mxu1 %v379_v56 }
 0x203   :  { %531 = vmatprep.subr.bf16.mxu1 %v566_v22 }
 0x206   :  { %532 = vmatpush3.bf16.msra.mxu1 %v378_v59 }
 0x209   :  { %534 = vmatmul.mubr.msk.bf16.vlgmr.msra.gmra.mxu1 %vm292_vm1, %v442_v60 }
 0x2c9   :  { %v423_v62 = vpop.f32.mrf.mxu1 }
 0x2ca   :  { %v424_v63 = vadd.f32 %v423_v62, %v384_v61 }
 0x2cb   :  { %v535_v0 = vpop.f32.mrf.mxu1 }
 0x2cc   :  { %429 = vst [vmem:[%s724_s3] sm:$0xff] %v424_v63 }
 0x2cd   :  { %v426_v1 = vpop.f32.mrf.mxu1 }
 0x2cf   :  { %v536_v2 = vpop.f32.mrf.mxu1 }

</bundles_post_ra>
